<compile_context>
chip_gen: v7x
topology: tpu7x:2x2x1
jax: 0.10.0
libtpu: 0.0.40
codegen_flags: <defaults>
</compile_context>

<pallas_src>
import functools

import jax
import jax.numpy as jnp
from jax.experimental import pallas as pl
from jax.experimental.pallas import tpu as pltpu


# --------------------------------------------------------------------------- #
# Kernel
# --------------------------------------------------------------------------- #
def _rmsnorm_kernel(x_ref, w_ref, o_ref, *, eps, inv_hidden):
    # Pass 1: sum of squares in f32 over the lane (hidden) axis.  The f32
    # upcast feeds straight into the reduction and is not reused afterwards.
    xf = x_ref[...].astype(jnp.float32)
    ssq = jnp.sum(xf * xf, axis=-1, keepdims=True)
    inv = jax.lax.rsqrt(ssq * inv_hidden + eps)          # EUP rsqrt

    # Pass 2: re-read the input-dtype block (VMEM resident), scale, round to
    # the input dtype (torch's `h.to(input_dtype)`), then weight-multiply in
    # the promoted output dtype.
    normed = (x_ref[...].astype(jnp.float32) * inv).astype(x_ref.dtype)
    normed = normed.astype(o_ref.dtype)

    w = w_ref[...]                                       # (gran, H), out dtype
    br, h = normed.shape
    wr = w.shape[0]
    if br == wr:
        o_ref[...] = w * normed
    else:
        # Tile-preserving reshape: (br, H) -> (br//wr, wr, H) keeps the
        # (sublane, lane) tiles intact; the weight broadcast is then over the
        # leading (untiled) axis only -> no per-step sublane broadcast.
        n3 = normed.reshape(br // wr, wr, h)
        o_ref[...] = (w[jnp.newaxis] * n3).reshape(br, h)


# --------------------------------------------------------------------------- #
# Tiling policy
# --------------------------------------------------------------------------- #
def _vmem_limit_bytes():
    """Scoped-VMEM limit to request: ~3/4 of physical VMEM on this chip."""
    try:
        cap = pltpu.get_tpu_info().vmem_capacity_bytes
    except Exception:
        cap = 64 * 1024 * 1024  # conservative fallback (v7x per-core VMEM)
    return int(cap * 3 // 4)


def _num_tensorcores():
    """TensorCores sharing the 'parallel' grid axis (v7x megacore -> 2)."""
    try:
        dev = jax.devices()[0]
        n = getattr(dev, "num_cores", None)
        if isinstance(n, int) and n > 0:
            return max(1, min(int(n), 4))
        kind = str(getattr(dev, "device_kind", "")).lower()
        if "v7" in kind or "7x" in kind or "v4" in kind:
            return 2
    except Exception:
        pass
    return 1


def _choose_block_rows(rows, hidden, x_itemsize, out_itemsize, gran, num_tc,
                       vmem_limit):
    """Byte-capped, VMEM-budgeted row tile, shaped evenly across TensorCores."""
    target_block_bytes = 8 << 20                 # ~8 MiB of input per grid step
    per_row_in = hidden * x_itemsize
    per_row_out = hidden * out_itemsize
    # VMEM accounting: double-buffered input + output blocks, plus one f32 row
    # of headroom for any materialized intermediate (Mosaic fuses the
    # elementwise chain at vreg granularity, so full-block f32 temporaries are
    # not budgeted).
    per_row_vmem = 2 * (per_row_in + per_row_out) + hidden * 4
    budget = max(per_row_vmem * gran, vmem_limit - (2 << 20))

    rows_g = -(-rows // gran)                    # rows in units of gran
    cap_g = max(1, min(target_block_bytes // (per_row_in * gran),
                       budget // (per_row_vmem * gran)))
    block_g = max(1, min(cap_g, rows_g))

    if num_tc > 1 and rows_g > 1:
        steps = -(-rows_g // block_g)
        # Step count a multiple of the TC count for even megacore sharding.
        steps = num_tc * (-(-steps // num_tc))
        # Prefer >=4 steps per core for DMA/compute overlap, as long as each
        # block still moves >= ~1 MiB of input.
        min_block_g = max(1, (1 << 20) // (per_row_in * gran))
        while (steps < 4 * num_tc and steps * 2 <= rows_g
               and -(-rows_g // (steps * 2)) >= min_block_g):
            steps *= 2
        bg = -(-rows_g // steps)
        # Walk down until the realized step count shards evenly across cores.
        while bg > 1 and (-(-rows_g // bg)) % num_tc != 0:
            bg -= 1
        block_g = max(1, min(bg, cap_g))

    return block_g * gran


# --------------------------------------------------------------------------- #
# Wrapper
# --------------------------------------------------------------------------- #
def rmsnorm_pallas(x, weight, eps=1e-6, block_rows=None):
    """DeepseekV2RMSNorm forward.  x: (..., hidden), weight: (hidden,).

    Output dtype follows torch promotion of `weight * h.to(input_dtype)`.
    """
    weight = jnp.asarray(weight)
    orig_shape = x.shape
    hidden = orig_shape[-1]
    out_dtype = jnp.promote_types(x.dtype, weight.dtype)

    x2d = x.reshape(-1, hidden)
    rows = x2d.shape[0]

    # Lane-dense hidden: pad to a multiple of 128 when needed (MLA production
    # sizes 512 / 1536 / 5120 / 7168 are already multiples -> no-op).  The
    # variance divisor uses the true hidden, so zero padding is exact.
    hidden_p = max(128, ((hidden + 127) // 128) * 128)
    w1d = weight.reshape(hidden).astype(out_dtype)
    if hidden_p != hidden:
        x2d = jnp.pad(x2d, ((0, 0), (0, hidden_p - hidden)))
        w1d = jnp.pad(w1d, (0, hidden_p - hidden))

    x_item = jnp.dtype(x.dtype).itemsize
    o_item = jnp.dtype(out_dtype).itemsize
    sub = {4: 8, 2: 16, 1: 32}
    gran = max(sub.get(x_item, 8), sub.get(o_item, 8))

    num_tc = _num_tensorcores()
    vmem_limit = _vmem_limit_bytes()

    if block_rows is None:
        block_rows = _choose_block_rows(rows, hidden_p, x_item, o_item, gran,
                                        num_tc, vmem_limit)
    else:
        block_rows = max(gran, (int(block_rows) // gran) * gran)

    # Weight as a sublane-full (gran, hidden) tile in the output dtype;
    # constant block index -> DMA'd once and VMEM-resident across the grid.
    w2d = jnp.broadcast_to(w1d[None, :], (gran, hidden_p))

    grid = (pl.cdiv(rows, block_rows),)

    kernel = functools.partial(_rmsnorm_kernel, eps=float(eps),
                               inv_hidden=1.0 / float(hidden))

    out = pl.pallas_call(
        kernel,
        out_shape=jax.ShapeDtypeStruct((rows, hidden_p), out_dtype),
        grid_spec=pltpu.PrefetchScalarGridSpec(
            num_scalar_prefetch=0,
            grid=grid,
            in_specs=[
                pl.BlockSpec((block_rows, hidden_p), lambda i: (i, 0)),
                pl.BlockSpec((gran, hidden_p), lambda i: (0, 0)),
            ],
            out_specs=pl.BlockSpec((block_rows, hidden_p), lambda i: (i, 0)),
        ),
        compiler_params=pltpu.CompilerParams(
            dimension_semantics=("parallel",),
            vmem_limit_bytes=vmem_limit,
        ),
    )(x2d, w2d)

    if hidden_p != hidden:
        out = out[:, :hidden]
    return out.reshape(orig_shape)


def rmsnorm_ref(x, weight, eps=1e-6):
    """Pure-JAX reference mirroring the PyTorch module (incl. promotion)."""
    input_dtype = x.dtype
    xf = x.astype(jnp.float32)
    variance = jnp.mean(xf * xf, axis=-1, keepdims=True)
    xf = xf * jax.lax.rsqrt(variance + eps)
    return jnp.asarray(weight) * xf.astype(input_dtype)


# --------------------------------------------------------------------------- #
# Self-test
# --------------------------------------------------------------------------- #
if __name__ == "__main__":
    key = jax.random.PRNGKey(0)
    batch, seq, hidden = 2, 8, 32
    x = jax.random.normal(key, (batch, seq, hidden), dtype=jnp.float32)
    # Deterministic parameter init: nn.Parameter(torch.ones(hidden_size))
    weight = jnp.ones((hidden,), dtype=jnp.float32)

    out = jax.block_until_ready(rmsnorm_pallas(x, weight, eps=1e-6))
    ref = rmsnorm_ref(x, weight, eps=1e-6)
    assert out.shape == x.shape and out.dtype == ref.dtype
    assert jnp.allclose(out, ref, atol=1e-5, rtol=1e-5), "f32 mismatch vs reference"

    # Ragged row count at non-128 hidden (exercises wrapper padding + masked
    # last row block).
    x2 = jax.random.normal(jax.random.PRNGKey(1), (1, 20, hidden), dtype=jnp.float32)
    out2 = jax.block_until_ready(rmsnorm_pallas(x2, weight, eps=1e-6))
    ref2 = rmsnorm_ref(x2, weight, eps=1e-6)
    assert jnp.allclose(out2, ref2, atol=1e-5, rtol=1e-5), "ragged mismatch vs reference"

    # bf16 weight + bf16 activations: multiply stays in bf16 (torch promotion),
    # output dtype bf16.
    xb = x.astype(jnp.bfloat16)
    wb = weight.astype(jnp.bfloat16)
    outb = jax.block_until_ready(rmsnorm_pallas(xb, wb, eps=1e-6))
    refb = rmsnorm_ref(xb, wb, eps=1e-6)
    assert outb.shape == xb.shape and outb.dtype == jnp.bfloat16
    assert jnp.allclose(outb.astype(jnp.float32), refb.astype(jnp.float32),
                        atol=2e-2, rtol=2e-2), "bf16 mismatch vs reference"

    # fp32 weight + bf16 activations: torch promotes the result to fp32.
    outm = jax.block_until_ready(rmsnorm_pallas(xb, weight, eps=1e-6))
    refm = rmsnorm_ref(xb, weight, eps=1e-6)
    assert outm.dtype == jnp.float32 and refm.dtype == jnp.float32
    assert jnp.allclose(outm, refm, atol=2e-2, rtol=2e-2), "mixed-dtype mismatch"

    # Production-style hidden (kv_a_layernorm width 512, bf16), explicit small
    # block so rows % block_rows != 0 exercises the ragged last grid block on
    # a 128-multiple hidden (unmasked lane stores, masked row writeback).
    xk = jax.random.normal(jax.random.PRNGKey(2), (4, 25, 512), dtype=jnp.bfloat16)
    wk = jnp.ones((512,), dtype=jnp.bfloat16)
    outk = jax.block_until_ready(rmsnorm_pallas(xk, wk, eps=1e-6, block_rows=32))
    refk = rmsnorm_ref(xk, wk, eps=1e-6)
    assert outk.shape == xk.shape and outk.dtype == jnp.bfloat16
    assert jnp.allclose(outk.astype(jnp.float32), refk.astype(jnp.float32),
                        atol=2e-2, rtol=2e-2), "hidden=512 ragged mismatch"

    print("KERNEL_OK")
</pallas_src>

<mosaic_0001>
module attributes {stable_mosaic.version = 11 : i64} {
  func.func @_rmsnorm_kernel(%arg0: i32, %arg1: memref<16x128xf32, #tpu.memory_space<vmem>>, %arg2: memref<8x128xf32, #tpu.memory_space<vmem>>, %arg3: memref<16x128xf32, #tpu.memory_space<vmem>>) attributes {dimension_semantics = [#tpu.dimension_semantics<parallel>], iteration_bounds = array<i64: 1>, scalar_prefetch = 0 : i64, scratch_operands = 0 : i64, tpu.core_type = #tpu.core_type<tc>, window_params = [{transform_indices = @transform_0, window_bounds = array<i64: 16, 128>}, {pipeline_mode = #tpu.pipeline_mode<synchronous>, transform_indices = @transform_1, window_bounds = array<i64: 8, 128>}, {transform_indices = @transform_2, window_bounds = array<i64: 16, 128>}]} {
    %c0 = arith.constant 0 : index
    %c0_0 = arith.constant 0 : index
    %0 = vector.load %arg1[%c0, %c0_0] : memref<16x128xf32, #tpu.memory_space<vmem>>, vector<16x128xf32>
    %1 = arith.mulf %0, %0 : vector<16x128xf32>
    %cst = arith.constant dense<0.000000e+00> : vector<16xf32>
    %2 = vector.multi_reduction <add>, %1, %cst [1] : vector<16x128xf32> to vector<16xf32>
    %3 = vector.shape_cast %2 : vector<16xf32> to vector<16x1xf32>
    %cst_1 = arith.constant 3.125000e-02 : f32
    %4 = vector.broadcast %cst_1 : f32 to vector<16x1xf32>
    %5 = arith.mulf %3, %4 : vector<16x1xf32>
    %cst_2 = arith.constant 9.99999997E-7 : f32
    %6 = vector.broadcast %cst_2 : f32 to vector<16x1xf32>
    %7 = arith.addf %5, %6 : vector<16x1xf32>
    %8 = math.rsqrt %7 : vector<16x1xf32>
    %c0_3 = arith.constant 0 : index
    %c0_4 = arith.constant 0 : index
    %9 = vector.load %arg1[%c0_3, %c0_4] : memref<16x128xf32, #tpu.memory_space<vmem>>, vector<16x128xf32>
    %10 = vector.broadcast %8 : vector<16x1xf32> to vector<16x128xf32>
    %11 = arith.mulf %9, %10 : vector<16x128xf32>
    %c0_5 = arith.constant 0 : index
    %c0_6 = arith.constant 0 : index
    %12 = vector.load %arg2[%c0_5, %c0_6] : memref<8x128xf32, #tpu.memory_space<vmem>>, vector<8x128xf32>
    %13 = vector.shape_cast %11 : vector<16x128xf32> to vector<2x8x128xf32>
    %14 = vector.shape_cast %12 : vector<8x128xf32> to vector<1x8x128xf32>
    %15 = vector.broadcast %14 : vector<1x8x128xf32> to vector<2x8x128xf32>
    %16 = arith.mulf %15, %13 : vector<2x8x128xf32>
    %17 = vector.shape_cast %16 : vector<2x8x128xf32> to vector<16x128xf32>
    %c0_7 = arith.constant 0 : index
    %c0_8 = arith.constant 0 : index
    %18 = vector.load %arg3[%c0_7, %c0_8] : memref<16x128xf32, #tpu.memory_space<vmem>>, vector<16x128xf32>
    tpu.vector_store %arg3[%c0_7, %c0_8], %17 {strides = array<i32>} : memref<16x128xf32, #tpu.memory_space<vmem>>, vector<16x128xf32>,
    return
  }
  func.func @transform_0(%arg0: i32) -> (i32, i32) {
    %c0_i32 = arith.constant 0 : i32
    %c0_i32_0 = arith.constant 0 : i32
    return %arg0, %c0_i32 : i32, i32
  }
  func.func @transform_1(%arg0: i32) -> (i32, i32) {
    %c0_i32 = arith.constant 0 : i32
    %c0_i32_0 = arith.constant 0 : i32
    %c0_i32_1 = arith.constant 0 : i32
    return %c0_i32, %c0_i32_0 : i32, i32
  }
  func.func @transform_2(%arg0: i32) -> (i32, i32) {
    %c0_i32 = arith.constant 0 : i32
    %c0_i32_0 = arith.constant 0 : i32
    return %arg0, %c0_i32 : i32, i32
  }
}

</mosaic_0001>

<bundles_post_ra>
// kernel: tpu_custom_call.1
= control target key start
LH: loop header
LB: loop body
LE: loop exit
PB: predicated region body
PF: predicated region fallthrough
CT: control target
= control target key end

     0   :  { %7 = vsyncpa [#allocation3], 0  ;;  %s220_s0 = inlined_call_operand.hbm [shape: f32[16,128], index: 0, kind: input, shape index: {}]   ;;  %s221_s1 = inlined_call_operand.hbm [shape: f32[8,128], index: 1, kind: input, shape index: {}]   ;;  %s222_s2 = inlined_call_operand.hbm [shape: f32[16,128], index: 2, kind: output, shape index: {}]  }
   0x1   :  { %8 = vsyncpa [#allocation6], 0 }
   0x2   :  { %9 = vsyncpa [#allocation4], 0  ;;  %s158_s9 = smov [#allocation2]   ;;  %s86_s13 = scalar_lea.hbm %s220_s0, 256 }
   0x3   :  { %s15_s10 = sshll.u32 %s158_s9, 4  ;;  %p87_p0 = scmp.ne.s32.totalorder %s220_s0, %s86_s13  ;;  %s16_s10 = int_to_ptr.vmem [resolvable:$true] %s15_s10 }
   0x4   :  { %p90_p1 = scmp.lt.u32.totalorder %s86_s13, %s220_s0 }
   0x6   :  { %p92_p2 = pnand %p90_p1, %p87_p0 }
   0x8   :  { %95 = shalt.err (!%p92_p2)
}
   0x9   :  { %s96_s18 = scalar_lea.vmem %s16_s10, 256  ;;  %p101_p4 = scmp.lt.s32.totalorder %s16_s10, %s16_s10 }
   0xa   :  { %p97_p3 = scmp.ne.s32.totalorder %s16_s10, %s96_s18  ;;  %p102_p5 = scmp.lt.s32.totalorder %s96_s18, %s96_s18 }
   0xc   :  { %p103_p6 = por %p102_p5, %p101_p4 }
   0xe   :  { %p104_p7 = pnand %p103_p6, %p97_p3 }
  0x10   :  { %107 = shalt.err (!%p104_p7)
}
  0x11   :  { %s159_s19 = smov 128   ;;  %s160_s20 = smov 8  }
  0x12   :  { %21 = dma.hbm_to_vmem [thread:$0]  %s220_s0, 256, %s16_s10, [#allocation3], %s159_s19, %s159_s19, %s160_s20  }
  0x13   :  { %s161_s23 = smov [#allocation5]   ;;  %s108_s27 = scalar_lea.hbm %s221_s1, 128 }
  0x14   :  { %s28_s24 = sshll.u32 %s161_s23, 4  ;;  %p109_p8 = scmp.ne.s32.totalorder %s221_s1, %s108_s27  ;;  %s29_s24 = int_to_ptr.vmem [resolvable:$true] %s28_s24 }
  0x15   :  { %p112_p9 = scmp.lt.u32.totalorder %s108_s27, %s221_s1 }
  0x17   :  { %p114_p10 = pnand %p112_p9, %p109_p8 }
  0x19   :  { %117 = shalt.err (!%p114_p10)
}
  0x1a   :  { %s118_s4 = scalar_lea.vmem %s29_s24, 128  ;;  %p123_p12 = scmp.lt.s32.totalorder %s29_s24, %s29_s24 }
  0x1b   :  { %p119_p11 = scmp.ne.s32.totalorder %s29_s24, %s118_s4  ;;  %p124_p13 = scmp.lt.s32.totalorder %s118_s4, %s118_s4 }
  0x1d   :  { %p125_p0 = por %p124_p13, %p123_p12 }
  0x1f   :  { %p126_p1 = pnand %p125_p0, %p119_p11 }
  0x21   :  { %129 = shalt.err (!%p126_p1)
}
  0x22   :  { %31 = dma.hbm_to_vmem [thread:$0]  %s221_s1, 128, %s29_s24, [#allocation6]  }
  0x23   :  { %152 = dma.done.wait [#allocation3], 256  }
  0x24   :  { %153 = vsyncadd [#allocation3], 4294967040 }
  0x25   :  { %154 = dma.done.wait [#allocation6], 128  }
  0x26   :  { %155 = vsyncadd [#allocation6], 4294967168  ;;  %v38_v0 = vld [vmem:[#allocation2] sm:$0xff]  ;;  %v39_v1 = vld [vmem:[#allocation2 + $0x8] sm:$0xff]  ;;  %s162_s1 = smov [#allocation7]  }
  0x27   :  { %v40_v2 = vmul.f32 %v38_v0, %v38_v0  ;;  %v41_v3 = vmul.f32 %v39_v1, %v39_v1  ;;  %v54_v11 = vld [vmem:[#allocation5] sm:$0xff]  ;;  %s64_s6 = sshll.u32 %s162_s1, 4  ;;  %s65_s6 = int_to_ptr.vmem [resolvable:$true] %s64_s6 }
  0x28   :  { %s130_s7 = scalar_lea.vmem %s65_s6, 256  ;;  %p135_p3 = scmp.lt.s32.totalorder %s65_s6, %s65_s6 }
  0x29   :  { %42 = vadd.xlane.f32.xlu0 %v40_v2  ;;  %p131_p2 = scmp.ne.s32.totalorder %s65_s6, %s130_s7  ;;  %p136_p4 = scmp.lt.s32.totalorder %s130_s7, %s130_s7 }
  0x2b   :  { %p137_p5 = por %p136_p4, %p135_p3 }
  0x2d   :  { %44 = vadd.xlane.f32.xlu0 %v41_v3  ;;  %p138_p6 = pnand %p137_p5, %p131_p2 }
  0xb6   :  { %v43_v4 = vpop.xlane.xlu0 %42 }
  0xb7   :  { %v46_v5 = vmul.f32 0.03125, %v43_v4 }
  0xb9   :  { %v48_v6 = vadd.f32 1e-06, %v46_v5 }
  0xba   :  { %v45_v7 = vpop.xlane.xlu0 %44 }
  0xbb   :  { %82 = vrsqrt.f32 %v48_v6  ;;  %v47_v8 = vmul.f32 0.03125, %v45_v7 }
  0xbd   :  { %v49_v9 = vadd.f32 1e-06, %v47_v8 }
  0xbf   :  { %84 = vrsqrt.f32 %v49_v9 }
  0xc5   :  { %v83_v10 = vpop.eup %82 }
  0xc6   :  { %v52_v12 = vmul.f32 %v83_v10, %v38_v0 }
  0xc8   :  { %v55_v13 = vmul.f32 %v54_v11, %v52_v12 }
  0xc9   :  { %v85_v14 = vpop.eup %84 }
  0xca   :  { %v53_v15 = vmul.f32 %v85_v14, %v39_v1  ;;  %57 = vst [vmem:[#allocation7] sm:$0xff] %v55_v13 }
  0xcc   :  { %v56_v16 = vmul.f32 %v54_v11, %v53_v15 }
  0xce   :  { %58 = vst [vmem:[#allocation7 + $0x8] sm:$0xff] %v56_v16 }
  0xcf   :  { %141 = shalt.err (!%p138_p6)
}
  0xd0   :  { %s142_s10 = scalar_lea.hbm %s222_s2, 256 }
  0xd1   :  { %p143_p7 = scmp.ne.s32.totalorder %s222_s2, %s142_s10  ;;  %p146_p8 = scmp.lt.u32.totalorder %s142_s10, %s222_s2 }
  0xd3   :  { %p148_p9 = pnand %p146_p8, %p143_p7 }
  0xd5   :  { %151 = shalt.err (!%p148_p9)
}
  0xd6   :  { %70 = dma.vmem_to_hbm [thread:$0]  %s65_s6, 256, %s222_s2, [#allocation4], %s159_s19, %s159_s19, %s160_s20  }
  0xd7   :  { %156 = dma.done.wait [#allocation4], 256  }
  0xd8   :  { %157 = vsyncadd [#allocation4], 4294967040 }
  0xd9   :  { %74 = vsyncpa [#allocation3], 1 }
  0xda   :  { %75 = vsyncpa [#allocation6], 1 }
  0xdb   :  { %76 = vsyncpa [#allocation4], 1 }

</bundles_post_ra>
